<compile_context>
chip_gen: v5e
topology: v5e:2x2
jax: 0.10.0
libtpu: 0.0.40
codegen_flags: <defaults>
</compile_context>

<pallas_src>
import jax
import jax.numpy as jnp
from jax.experimental import pallas as pl
from jax.experimental.pallas import tpu as pltpu


def _round_up(a, b):
    return (a + b - 1) // b * b


def _glu_kernel(x_ref, w_ref, b_ref, o_ref, acc_ref):
    # x_ref : (tm, tk)       bf16
    # w_ref : (tk, 2*tn)     bf16   -> [wx_tile | wg_tile]
    # b_ref : (1, 2*tn)      f32    -> [bx_tile | bg_tile]
    # o_ref : (tm, tn)
    # acc_ref: (tm, 2*tn)    f32 accumulator (persists across K axis)
    k = pl.program_id(2)

    @pl.when(k == 0)
    def _():
        acc_ref[...] = jnp.zeros_like(acc_ref)

    # One long MXU push per grid step (both halves fused in the N dimension).
    acc_ref[...] += jnp.dot(x_ref[...], w_ref[...],
                            preferred_element_type=jnp.float32)

    @pl.when(k == pl.num_programs(2) - 1)
    def _():
        tn = o_ref.shape[-1]
        h = acc_ref[...] + b_ref[...]          # f32 bias add
        xp = h[:, :tn]                         # 128-aligned static split
        g = h[:, tn:]
        o_ref[...] = (xp * (g * jax.nn.sigmoid(g))).astype(o_ref.dtype)


def prepare_glu_params(weight, bias, dim_out, *, tn=512, tk=1024,
                       param_dtype=jnp.bfloat16):
    """One-time parameter prep (do this at load time, cache the result).

    weight: (2*dim_out, dim_in) torch nn.Linear layout; bias: (2*dim_out,).
    Returns (w_packed, b_packed, meta) where w_packed is (dim_in_p, 2*dim_out_p)
    with per-output-tile interleaving: tile j holds [wx_j | wg_j].
    """
    two_dout, dim_in = weight.shape
    assert two_dout == 2 * dim_out

    tn = min(tn, _round_up(dim_out, 128))          # lane-dense, multiple of 128
    assert tn % 128 == 0
    dim_out_p = _round_up(dim_out, tn)
    nj = dim_out_p // tn

    dim_in_p = dim_in if dim_in <= tk else _round_up(dim_in, tk)
    tk = min(tk, dim_in_p)

    wx = weight[:dim_out, :].T                     # (dim_in, dim_out)
    wg = weight[dim_out:, :].T
    pad_w = ((0, dim_in_p - dim_in), (0, dim_out_p - dim_out))
    wx = jnp.pad(wx, pad_w)
    wg = jnp.pad(wg, pad_w)
    w_packed = jnp.stack(
        [wx.reshape(dim_in_p, nj, tn), wg.reshape(dim_in_p, nj, tn)], axis=2
    ).reshape(dim_in_p, 2 * dim_out_p).astype(param_dtype)

    bx = jnp.pad(bias[:dim_out], (0, dim_out_p - dim_out))
    bg = jnp.pad(bias[dim_out:], (0, dim_out_p - dim_out))
    b_packed = jnp.stack(
        [bx.reshape(nj, tn), bg.reshape(nj, tn)], axis=1
    ).reshape(1, 2 * dim_out_p).astype(jnp.float32)

    meta = dict(dim_in=dim_in, dim_in_p=dim_in_p,
                dim_out=dim_out, dim_out_p=dim_out_p, tn=tn, tk=tk)
    return w_packed, b_packed, meta


def glu_forward(x, w_packed, b_packed, meta, *, tm=256):
    """x: (B, N, dim_in) -> (B, N, dim_out)."""
    B, N, dim_in = x.shape
    assert dim_in == meta["dim_in"]
    dim_in_p, dim_out = meta["dim_in_p"], meta["dim_out"]
    dim_out_p, tn, tk = meta["dim_out_p"], meta["tn"], meta["tk"]

    M = B * N
    tm = min(tm, _round_up(M, 8))                  # clamp for tiny inputs
    M_p = _round_up(M, tm)

    x2d = x.reshape(M, dim_in)
    if M_p != M or dim_in_p != dim_in:
        x2d = jnp.pad(x2d, ((0, M_p - M), (0, dim_in_p - dim_in)))
    x2d = x2d.astype(w_packed.dtype)               # bf16 MXU inputs

    ni = M_p // tm
    nj = dim_out_p // tn
    nk = dim_in_p // tk

    in_bytes = jnp.dtype(w_packed.dtype).itemsize
    out_bytes = jnp.dtype(x.dtype).itemsize
    vmem_est = (2 * tm * tk * in_bytes             # x double-buffer
                + 2 * tk * 2 * tn * in_bytes       # fused weight double-buffer
                + 2 * 2 * tn * 4                   # bias
                + 2 * tm * tn * out_bytes          # output double-buffer
                + tm * 2 * tn * 4)                 # f32 accumulator
    vmem_limit = min(max(32 * 1024 * 1024, 2 * vmem_est), 64 * 1024 * 1024)

    out2d = pl.pallas_call(
        _glu_kernel,
        out_shape=jax.ShapeDtypeStruct((M_p, dim_out_p), x.dtype),
        grid_spec=pltpu.PrefetchScalarGridSpec(
            num_scalar_prefetch=0,
            grid=(ni, nj, nk),
            in_specs=[
                pl.BlockSpec((tm, tk), lambda i, j, k: (i, k)),
                pl.BlockSpec((tk, 2 * tn), lambda i, j, k: (k, j)),
                pl.BlockSpec((1, 2 * tn), lambda i, j, k: (0, j)),
            ],
            out_specs=pl.BlockSpec((tm, tn), lambda i, j, k: (i, j)),
            scratch_shapes=[pltpu.VMEM((tm, 2 * tn), jnp.float32)],
        ),
        compiler_params=pltpu.CompilerParams(
            dimension_semantics=("parallel", "parallel", "arbitrary"),
            vmem_limit_bytes=vmem_limit,
        ),
    )(x2d, w_packed, b_packed)

    return out2d[:M, :dim_out].reshape(B, N, dim_out)


def _reference(x, weight, bias, dim_out):
    h = jnp.einsum("bnd,od->bno", x, weight, precision="highest") + bias
    xp, g = h[..., :dim_out], h[..., dim_out:]
    return xp * jax.nn.silu(g)


def _run_case(key, B, N, dim_in, dim_out):
    kx, kw, kb = jax.random.split(key, 3)
    x = jax.random.normal(kx, (B, N, dim_in), dtype=jnp.float32)
    # nn.Linear default init: U(-1/sqrt(dim_in), 1/sqrt(dim_in))
    bound = 1.0 / (dim_in ** 0.5)
    weight = jax.random.uniform(kw, (2 * dim_out, dim_in),
                                minval=-bound, maxval=bound, dtype=jnp.float32)
    bias = jax.random.uniform(kb, (2 * dim_out,),
                              minval=-bound, maxval=bound, dtype=jnp.float32)

    w_packed, b_packed, meta = prepare_glu_params(weight, bias, dim_out)
    out = glu_forward(x, w_packed, b_packed, meta)
    out = jax.block_until_ready(out)
    assert out.shape == (B, N, dim_out)

    # Reference computed on bf16-quantized inputs (kernel feeds the MXU in bf16
    # with f32 accumulation), so tolerances can stay tight.
    x_q = x.astype(jnp.bfloat16).astype(jnp.float32)
    w_q = weight.astype(jnp.bfloat16).astype(jnp.float32)
    ref = _reference(x_q, w_q, bias, dim_out)
    assert jnp.allclose(out, ref, atol=1e-3, rtol=1e-3), (
        float(jnp.max(jnp.abs(out - ref))))


if __name__ == "__main__":
    key = jax.random.PRNGKey(0)
    k1, k2 = jax.random.split(key)

    # Small demo shape (B, N, dim_in, dim_out) = (2, 8, 32, 32); exercises
    # dim_out padding to the 128-lane boundary.
    _run_case(k1, B=2, N=8, dim_in=32, dim_out=32)

    # Unaligned dims to exercise row / column / K padding and slicing.
    _run_case(k2, B=2, N=12, dim_in=40, dim_out=48)

    print("KERNEL_OK")
</pallas_src>

<mosaic_0001>
module attributes {stable_mosaic.version = 11 : i64} {
  func.func @_glu_kernel(%arg0: i32, %arg1: i32, %arg2: i32, %arg3: memref<16x32xbf16, #tpu.memory_space<vmem>>, %arg4: memref<32x256xbf16, #tpu.memory_space<vmem>>, %arg5: memref<1x256xf32, #tpu.memory_space<vmem>>, %arg6: memref<16x128xf32, #tpu.memory_space<vmem>>, %arg7: memref<16x256xf32, #tpu.memory_space<vmem>>) attributes {dimension_semantics = [#tpu.dimension_semantics<parallel>, #tpu.dimension_semantics<parallel>, #tpu.dimension_semantics<arbitrary>], iteration_bounds = array<i64: 1, 1, 1>, scalar_prefetch = 0 : i64, scratch_operands = 1 : i64, tpu.core_type = #tpu.core_type<tc>, window_params = [{transform_indices = @transform_0, window_bounds = array<i64: 16, 32>}, {transform_indices = @transform_1, window_bounds = array<i64: 32, 256>}, {transform_indices = @transform_2, window_bounds = array<i64: 1, 256>}, {transform_indices = @transform_3, window_bounds = array<i64: 16, 128>}]} {
    %c0_i32 = arith.constant 0 : i32
    %0 = arith.cmpi eq, %arg2, %c0_i32 : i32
    %1 = arith.extui %0 : i1 to i32
    %c0_i32_0 = arith.constant 0 : i32
    %2 = arith.cmpi ne, %1, %c0_i32_0 : i32
    scf.if %2 {
      %cst_10 = arith.constant 0.000000e+00 : f32
      %12 = vector.broadcast %cst_10 : f32 to vector<16x256xf32>
      %c0_11 = arith.constant 0 : index
      %c0_12 = arith.constant 0 : index
      %13 = vector.load %arg7[%c0_11, %c0_12] : memref<16x256xf32, #tpu.memory_space<vmem>>, vector<16x256xf32>
      tpu.vector_store %arg7[%c0_11, %c0_12], %12 {strides = array<i32>} : memref<16x256xf32, #tpu.memory_space<vmem>>, vector<16x256xf32>,
    } else {
    }
    %c0 = arith.constant 0 : index
    %c0_1 = arith.constant 0 : index
    %3 = vector.load %arg7[%c0, %c0_1] : memref<16x256xf32, #tpu.memory_space<vmem>>, vector<16x256xf32>
    %c0_2 = arith.constant 0 : index
    %c0_3 = arith.constant 0 : index
    %4 = vector.load %arg3[%c0_2, %c0_3] : memref<16x32xbf16, #tpu.memory_space<vmem>>, vector<16x32xbf16>
    %c0_4 = arith.constant 0 : index
    %c0_5 = arith.constant 0 : index
    %5 = vector.load %arg4[%c0_4, %c0_5] : memref<32x256xbf16, #tpu.memory_space<vmem>>, vector<32x256xbf16>
    %cst = arith.constant dense<0.000000e+00> : vector<16x256xf32>
    %6 = tpu.matmul %4, %5, %cst {dimension_numbers = #tpu.dot_dimension_numbers<[1], [0], [0], [1], [0, 0, 1, 1], [], []>} : vector<16x32xbf16>, vector<32x256xbf16>, vector<16x256xf32> -> vector<16x256xf32>
    %7 = arith.addf %3, %6 : vector<16x256xf32>
    %c0_6 = arith.constant 0 : index
    %c0_7 = arith.constant 0 : index
    %8 = vector.load %arg7[%c0_6, %c0_7] : memref<16x256xf32, #tpu.memory_space<vmem>>, vector<16x256xf32>
    tpu.vector_store %arg7[%c0_6, %c0_7], %7 {strides = array<i32>} : memref<16x256xf32, #tpu.memory_space<vmem>>, vector<16x256xf32>,
    %c0_i32_8 = arith.constant 0 : i32
    %9 = arith.cmpi eq, %arg2, %c0_i32_8 : i32
    %10 = arith.extui %9 : i1 to i32
    %c0_i32_9 = arith.constant 0 : i32
    %11 = arith.cmpi ne, %10, %c0_i32_9 : i32
    scf.if %11 {
      %c0_10 = arith.constant 0 : index
      %c0_11 = arith.constant 0 : index
      %12 = vector.load %arg7[%c0_10, %c0_11] : memref<16x256xf32, #tpu.memory_space<vmem>>, vector<16x256xf32>
      %c0_12 = arith.constant 0 : index
      %c0_13 = arith.constant 0 : index
      %13 = vector.load %arg5[%c0_12, %c0_13] : memref<1x256xf32, #tpu.memory_space<vmem>>, vector<1x256xf32>
      %14 = vector.broadcast %13 : vector<1x256xf32> to vector<16x256xf32>
      %15 = arith.addf %12, %14 : vector<16x256xf32>
      %16 = vector.extract_strided_slice %15 {offsets = [0, 0], sizes = [16, 128], strides = [1, 1]} : vector<16x256xf32> to vector<16x128xf32>
      %17 = vector.extract_strided_slice %15 {offsets = [0, 128], sizes = [16, 128], strides = [1, 1]} : vector<16x256xf32> to vector<16x128xf32>
      %18 = arith.negf %17 : vector<16x128xf32>
      %19 = math.exp %18 : vector<16x128xf32>
      %cst_14 = arith.constant 1.000000e+00 : f32
      %20 = vector.broadcast %cst_14 : f32 to vector<16x128xf32>
      %21 = arith.addf %20, %19 : vector<16x128xf32>
      %22 = arith.divf %20, %21 : vector<16x128xf32>
      %23 = arith.mulf %17, %22 : vector<16x128xf32>
      %24 = arith.mulf %16, %23 : vector<16x128xf32>
      %c0_15 = arith.constant 0 : index
      %c0_16 = arith.constant 0 : index
      %25 = vector.load %arg6[%c0_15, %c0_16] : memref<16x128xf32, #tpu.memory_space<vmem>>, vector<16x128xf32>
      tpu.vector_store %arg6[%c0_15, %c0_16], %24 {strides = array<i32>} : memref<16x128xf32, #tpu.memory_space<vmem>>, vector<16x128xf32>,
    } else {
    }
    return
  }
  func.func @transform_0(%arg0: i32, %arg1: i32, %arg2: i32) -> (i32, i32) {
    %c0_i32 = arith.constant 0 : i32
    return %arg0, %arg2 : i32, i32
  }
  func.func @transform_1(%arg0: i32, %arg1: i32, %arg2: i32) -> (i32, i32) {
    %c0_i32 = arith.constant 0 : i32
    return %arg2, %arg1 : i32, i32
  }
  func.func @transform_2(%arg0: i32, %arg1: i32, %arg2: i32) -> (i32, i32) {
    %c0_i32 = arith.constant 0 : i32
    %c0_i32_0 = arith.constant 0 : i32
    return %c0_i32, %arg1 : i32, i32
  }
  func.func @transform_3(%arg0: i32, %arg1: i32, %arg2: i32) -> (i32, i32) {
    %c0_i32 = arith.constant 0 : i32
    return %arg0, %arg1 : i32, i32
  }
}

</mosaic_0001>

<bundles_post_ra>
// kernel: tpu_custom_call.1
= control target key start
LH: loop header
LB: loop body
LE: loop exit
PB: predicated region body
PF: predicated region fallthrough
CT: control target
= control target key end

     0   :  { %8 = vsyncpa [#allocation4], 0  ;;  %s418_s0 = inlined_call_operand.hbm [shape: bf16[16,32], index: 0, kind: input, shape index: {}]   ;;  %s419_s1 = inlined_call_operand.hbm [shape: bf16[32,256], index: 1, kind: input, shape index: {}]   ;;  %s420_s2 = inlined_call_operand.hbm [shape: f32[1,256], index: 2, kind: input, shape index: {}]   ;;  %s421_s3 = inlined_call_operand.hbm [shape: f32[16,128], index: 3, kind: output, shape index: {}]  }
   0x1   :  { %9 = vsyncpa [#allocation7], 0  ;;  %s28_s14 = sshll.u32 %s419_s1, 4  ;;  %s29_s14 = int_to_ptr.hbm [resolvable:$true] %s28_s14 }
   0x2   :  { %10 = vsyncpa [#allocation5], 0  ;;  %s372_s15 = smov [#allocation6]   ;;  %s15_s19 = sshll.u32 %s418_s0, 4  ;;  %s16_s19 = int_to_ptr.hbm [resolvable:$true] %s15_s19 }
   0x3   :  { %s30_s16 = sshll.u32 %s372_s15, 4  ;;  %s373_s20 = smov 128   ;;  %s31_s16 = int_to_ptr.vmem [resolvable:$true] %s30_s16 }
   0x4   :  { %s374_s21 = smov 8   ;;  %s375_s22 = smov [#allocation3]  }
   0x5   :  { %36 = dma.hbm_to_vmem [thread:$0]  %s29_s14, 512, %s31_s16, [#allocation7], %s373_s20, %s373_s20, %s374_s21  }
   0x6   :  { %s17_s23 = sshll.u32 %s375_s22, 4  ;;  %s376_s1 = smov 64   ;;  %s18_s23 = int_to_ptr.vmem [resolvable:$true] %s17_s23 }
   0x7   :  { %s377_s24 = smov 4   ;;  %s42_s27 = sshll.u32 %s420_s2, 4  ;;  %s43_s27 = int_to_ptr.hbm [resolvable:$true] %s42_s27 }
   0x8   :  { %23 = dma.hbm_to_vmem [thread:$0]  %s16_s19, 128, %s18_s23, [#allocation4], %s376_s1, %s376_s1, %s377_s24  }
   0x9   :  { %s378_s28 = smov [#allocation8]  }
   0xa   :  { %s44_s0 = sshll.u32 %s378_s28, 4  ;;  %s45_s0 = int_to_ptr.vmem [resolvable:$true] %s44_s0 }
   0xb   :  { %47 = dma.hbm_to_vmem [thread:$0]  %s43_s27, 32, %s45_s0, [#allocation7]  }
   0xc   :  { %366 = dma.done.wait [#allocation4], 128  }
   0xd   :  { %367 = vsyncadd [#allocation4], 4294967168 }
   0xe   :  { %368 = dma.done.wait [#allocation7], 544  }
   0xf   :  { %369 = vsyncadd [#allocation7], 4294966752  ;;  %v252_v0 = vld [vmem:[#allocation6 + $0x14] sm:$0xf]  ;;  %v241_v1 = vld [vmem:[#allocation6 + $0x18] sm:$0xf0] }
  0x10   :  { %v250_v2 = vld [vmem:[#allocation6 + $0x4] sm:$0xf]  ;;  %v244_v3 = vor.u32 %v252_v0, %v241_v1  ;;  %v233_v4 = vld [vmem:[#allocation6 + $0x8] sm:$0xf0]  ;;  %v239_v5 = vld [vmem:[#allocation6 + $0x10] sm:$0xf] }
  0x11   :  { %v253_v6 = vld [vmem:[#allocation6 + $0x14] sm:$0xf0]  ;;  %v231_v7 = vld [vmem:[#allocation6] sm:$0xf]  ;;  %v251_v8 = vld [vmem:[#allocation6 + $0x4] sm:$0xf0]  ;;  %v236_v9 = vor.u32 %v250_v2, %v233_v4 }
  0x12   :  { %128 = vmatpush.bf16.msra.mxu1 %v244_v3  ;;  %v240_v10 = vor.u32 %v253_v6, %v239_v5  ;;  %v232_v11 = vor.u32 %v251_v8, %v231_v7  ;;  %v249_v12 = vld [vmem:[#allocation3] sm:$0xff]  ;;  %vm104_vm0 = vcmask 261120   ;;  %v151_v13 = vld [vmem:[#allocation8] sm:$0x3]  ;;  %s379_s2 = smov [#allocation9]   ;;  %s211_s5 = sshll.u32 %s421_s3, 4  ;;  %s212_s5 = int_to_ptr.hbm [resolvable:$true] %s211_s5 }
  0x13   :  { %v154_v14 = vperm.slane %v151_v13, 1  ;;  %v153_v31 = vperm.slane %v151_v13, 0  ;;  %s209_s29 = sshll.u32 %s379_s2, 4  ;;  %s210_s29 = int_to_ptr.vmem [resolvable:$true] %s209_s29 }
  0x14   :  { %114 = vmatpush.bf16.msra.mxu0 %v240_v10 }
  0x16   :  { %129 = vmatpush.bf16.msra.mxu1 %v236_v9 }
  0x18   :  { %115 = vmatpush.bf16.msra.mxu0 %v232_v11 }
  0x19   :  { %246 = vmatmul.msk.bf16.vlgmr.msra.gmra.mxu1 %vm104_vm0, %v249_v12 }
  0x1b   :  { %245 = vmatmul.msk.bf16.vlgmr.msra.gmra.mxu0 %vm104_vm0, %v249_v12 }
  0x96   :  { %v131_v15 = vpop.f32.mrf.mxu1 }
  0x97   :  { %v158_v16 = vadd.f32 %v154_v14, %v131_v15 }
  0x98   :  { %v117_v32 = vpop.f32.mrf.mxu0 }
  0x99   :  { %v247_v17 = vmul.f32 -1.442695, %v158_v16  ;;  %v157_v38 = vadd.f32 %v153_v31, %v117_v32 }
  0x9b   :  { %262 = vpow2.f32 %v247_v17 }
  0x9e   :  { %v133_v18 = vpop.f32.mrf.mxu1 }
  0x9f   :  { %v160_v19 = vadd.f32 %v154_v14, %v133_v18 }
  0xa0   :  { %v119_v48 = vpop.f32.mrf.mxu0 }
  0xa1   :  { %v263_v20 = vpop.eup %262  ;;  %v248_v21 = vmul.f32 -1.442695, %v160_v19  ;;  %v159_v52 = vadd.f32 %v153_v31, %v119_v48 }
  0xa2   :  { %v167_v22 = vadd.f32 1.0, %v263_v20 }
  0xa3   :  { %264 = vpow2.f32 %v248_v21 }
  0xa4   :  { %266 = vrcp.f32 %v167_v22  ;;  %v180_v28 = vand.u32 2147483648, %v167_v22  ;;  %v178_v30 = vand.u32 2147483647, %v167_v22  ;;  %vm174_vm2 = vweird.f32 %v167_v22 }
  0xa6   :  { %v181_v35 = vor.u32 1.1754944e-38, %v180_v28  ;;  %vm179_vm4 = vcmp.eq.f32.partialorder %v178_v30, 8.507059e+37 }
  0xa9   :  { %v265_v23 = vpop.eup %264 }
  0xaa   :  { %v267_v24 = vpop.eup %266  ;;  %v168_v25 = vadd.f32 1.0, %v265_v23 }
  0xab   :  { %v170_v26 = vmul.f32 %v267_v24, %v167_v22  ;;  %vm175_vm1 = vweird.f32 %v267_v24 }
  0xac   :  { %268 = vrcp.f32 %v168_v25  ;;  %vm176_vm3 = vmor %vm174_vm2, %vm175_vm1  ;;  %v195_v42 = vand.u32 2147483648, %v168_v25  ;;  %v193_v44 = vand.u32 2147483647, %v168_v25  ;;  %vm189_vm6 = vweird.f32 %v168_v25 }
  0xad   :  { %v171_v27 = vsub.f32 1.0, %v170_v26 }
  0xae   :  { %v196_v47 = vor.u32 1.1754944e-38, %v195_v42  ;;  %vm194_vm8 = vcmp.eq.f32.partialorder %v193_v44, 8.507059e+37 }
  0xaf   :  { %v172_v29 = vmul.f32 %v267_v24, %v171_v27 }
  0xb1   :  { %v173_v33 = vadd.f32 %v267_v24, %v172_v29 }
  0xb2   :  { %v269_v34 = vpop.eup %268 }
  0xb3   :  { %v177_v36 = vsel %vm176_vm3, %v267_v24, %v173_v33  ;;  %v185_v37 = vmul.f32 %v269_v34, %v168_v25  ;;  %vm190_vm5 = vweird.f32 %v269_v34 }
  0xb4   :  { %v182_v39 = vsel %vm179_vm4, %v181_v35, %v177_v36  ;;  %vm191_vm7 = vmor %vm189_vm6, %vm190_vm5 }
  0xb5   :  { %v199_v40 = vmul.f32 %v182_v39, %v158_v16  ;;  %v186_v41 = vsub.f32 1.0, %v185_v37 }
  0xb7   :  { %v187_v43 = vmul.f32 %v269_v34, %v186_v41  ;;  %v201_v45 = vmul.f32 %v199_v40, %v157_v38 }
  0xb9   :  { %v188_v46 = vadd.f32 %v269_v34, %v187_v43  ;;  %203 = vst [vmem:[#allocation9] sm:$0xff] %v201_v45 }
  0xbb   :  { %v192_v49 = vsel %vm191_vm7, %v269_v34, %v188_v46 }
  0xbc   :  { %v197_v50 = vsel %vm194_vm8, %v196_v47, %v192_v49 }
  0xbd   :  { %v200_v51 = vmul.f32 %v197_v50, %v160_v19 }
  0xbf   :  { %v202_v53 = vmul.f32 %v200_v51, %v159_v52 }
  0xc1   :  { %204 = vst [vmem:[#allocation9 + $0x8] sm:$0xff] %v202_v53 }
  0xc2   :  { %217 = dma.vmem_to_hbm [thread:$0]  %s210_s29, 256, %s212_s5, [#allocation5], %s373_s20, %s373_s20, %s374_s21  }
  0xc3   :  { %370 = dma.done.wait [#allocation5], 256  }
  0xc4   :  { %371 = vsyncadd [#allocation5], 4294967040 }
  0xc5   :  { %222 = vsyncpa [#allocation4], 1 }
  0xc6   :  { %223 = vsyncpa [#allocation7], 1 }
  0xc7   :  { %224 = vsyncpa [#allocation5], 1 }

</bundles_post_ra>
